<compile_context>
chip_gen: v7x
topology: tpu7x:2x2x1
jax: 0.10.0
libtpu: 0.0.40
codegen_flags: <defaults>
</compile_context>

<pallas_src>
import jax
import jax.numpy as jnp
from jax import lax
from jax.experimental import pallas as pl
from jax.experimental.pallas import tpu as pltpu

_LANES = 128
_MAX_BLOCK_ROWS = 4096   # (4096, 128) f32 = 2 MiB per input per pipeline buffer


def _detect_num_core_splits():
    """Use a 2-way parallel grid split only on 2-TensorCore chips (v7x)."""
    try:
        kind = jax.devices()[0].device_kind.lower()
    except Exception:
        return 1
    return 2 if ("v7" in kind or "7x" in kind) else 1


def _make_wbce_kernel(rows, block_rows, num_blocks, lanes):
    """Build the kernel with static geometry closed over."""
    # Number of valid rows in the last real block (static Python int).
    last_valid_rows = rows - (num_blocks - 1) * block_rows
    last_is_partial = last_valid_rows != block_rows

    def kernel(pred_ref, gt_ref, acc_ref):
        c = pl.program_id(0)                      # core-split index (parallel)
        i = pl.program_id(1)                      # reduction step (arbitrary)
        block_id = c * pl.num_programs(1) + i     # global block index

        @pl.when(i == 0)
        def _():
            acc_ref[...] = jnp.zeros_like(acc_ref)

        def accumulate(mask_tail_rows):
            x = pred_ref[...].astype(jnp.float32)
            y = gt_ref[...].astype(jnp.float32)
            # Numerically stable (same as PyTorch BCEWithLogitsLoss):
            #   -log sigmoid(-x) = max(x, 0) + log1p(exp(-|x|))
            #   -log sigmoid( x) = -log sigmoid(-x) - x
            nl_neg = jnp.maximum(x, 0.0) + jnp.log1p(jnp.exp(-jnp.abs(x)))
            nl_pos = nl_neg - x
            if mask_tail_rows:
                # Only whole trailing rows can be invalid (lane dim is exact);
                # select (not multiply) so garbage cannot inject NaN/Inf.
                row_idx = lax.broadcasted_iota(
                    jnp.int32, (block_rows, lanes), 0)
                valid = row_idx < last_valid_rows
                y = jnp.where(valid, y, 0.0)
                nl_neg = jnp.where(valid, nl_neg, 0.0)
                nl_pos = jnp.where(valid, nl_pos, 0.0)
            s_gt = jnp.sum(y, axis=0, keepdims=True)
            s_pos = jnp.sum(y * nl_pos, axis=0, keepdims=True)
            s_neg = jnp.sum(nl_neg - y * nl_neg, axis=0, keepdims=True)
            pad = jnp.zeros((5, lanes), jnp.float32)
            # One full-tile (8, 128) read-modify-write per step.
            acc_ref[...] += jnp.concatenate([s_gt, s_pos, s_neg, pad], axis=0)

        if last_is_partial:
            @pl.when(block_id < num_blocks - 1)
            def _():
                accumulate(False)     # interior blocks: unmasked fast path

            @pl.when(block_id == num_blocks - 1)
            def _():
                accumulate(True)      # single partial last block: row mask
        else:
            @pl.when(block_id < num_blocks)
            def _():
                accumulate(False)     # all real blocks unmasked; overhang skipped

    return kernel


def weight_bce_with_logits_loss(pred, gt, eposion=1e-10, alpha=1.0,
                                max_block_rows=_MAX_BLOCK_ROWS):
    """Pallas implementation of WeightBCEWithLogitsLoss.forward(pred, gt)."""
    assert pred.shape == gt.shape
    n_valid = int(pred.size)

    # Flatten (free for contiguous arrays); keep native dtypes, cast per-tile.
    flat_pred = jnp.ravel(pred)
    flat_gt = jnp.ravel(gt)

    rows = n_valid // _LANES
    n_main = rows * _LANES
    tail = n_valid - n_main

    # <128-element unaligned tail is evaluated in plain JAX (no O(N) pad copy).
    if tail:
        tp = flat_pred[n_main:].astype(jnp.float32)
        tg = flat_gt[n_main:].astype(jnp.float32)
        t_nl_neg = jnp.maximum(tp, 0.0) + jnp.log1p(jnp.exp(-jnp.abs(tp)))
        t_nl_pos = t_nl_neg - tp
        tail_gt_sum = jnp.sum(tg)
        tail_pos_sum = jnp.sum(tg * t_nl_pos)
        tail_neg_sum = jnp.sum((1.0 - tg) * t_nl_neg)
    else:
        tail_gt_sum = tail_pos_sum = tail_neg_sum = jnp.float32(0.0)

    if rows == 0:
        # Fewer than 128 elements: nothing for the kernel to do.
        sum_gt, sum_pos, sum_neg = tail_gt_sum, tail_pos_sum, tail_neg_sum
    else:
        pred2d = flat_pred[:n_main].reshape(rows, _LANES)
        gt2d = flat_gt[:n_main].reshape(rows, _LANES)

        # Either one full-array block, or 4096-row streaming tiles.
        block_rows = rows if rows <= max_block_rows else max_block_rows
        num_blocks = pl.cdiv(rows, block_rows)
        splits = max(1, min(_detect_num_core_splits(), num_blocks))
        steps = pl.cdiv(num_blocks, splits)

        def in_index(c, i):
            # Clamp so a split whose range overhangs simply re-reads the last
            # in-bounds block; its compute is skipped in-kernel.
            return (jnp.minimum(c * steps + i, num_blocks - 1), 0)

        in_spec = pl.BlockSpec((block_rows, _LANES), in_index)
        # One resident (8, 128) per-lane accumulator slot per core split.
        out_spec = pl.BlockSpec((None, 8, _LANES), lambda c, i: (c, 0, 0))

        kernel = _make_wbce_kernel(rows, block_rows, num_blocks, _LANES)

        acc = pl.pallas_call(
            kernel,
            grid=(splits, steps),
            in_specs=[in_spec, in_spec],
            out_specs=out_spec,
            out_shape=jax.ShapeDtypeStruct((splits, 8, _LANES), jnp.float32),
            compiler_params=pltpu.CompilerParams(
                dimension_semantics=("parallel", "arbitrary")),
        )(pred2d, gt2d)

        totals = jnp.sum(acc, axis=(0, 2))
        sum_gt = totals[0] + tail_gt_sum
        sum_pos = totals[1] + tail_pos_sum
        sum_neg = totals[2] + tail_neg_sum

    # Scalar glue (exactly the module's math).
    n = jnp.float32(n_valid)
    count_pos = sum_gt * alpha + eposion
    count_neg = (n - sum_gt) * alpha
    beta = count_neg / count_pos
    beta_back = count_pos / (count_pos + count_neg)
    mean_bce = (sum_neg + beta * sum_pos) / n
    return beta_back * mean_bce


def _reference(pred, gt, eposion=1e-10, alpha=1.0):
    """Pure-JAX reference for a silent correctness check."""
    pred = pred.astype(jnp.float32)
    gt = gt.astype(jnp.float32)
    count_pos = jnp.sum(gt) * alpha + eposion
    count_neg = jnp.sum(1.0 - gt) * alpha
    beta = count_neg / count_pos
    beta_back = count_pos / (count_pos + count_neg)
    softplus_abs = jnp.log1p(jnp.exp(-jnp.abs(pred)))
    neg_logsig_pos = jnp.maximum(-pred, 0.0) + softplus_abs
    neg_logsig_neg = jnp.maximum(pred, 0.0) + softplus_abs
    per_elem = beta * gt * neg_logsig_pos + (1.0 - gt) * neg_logsig_neg
    return beta_back * jnp.mean(per_elem)


def _check(pred, gt, **kwargs):
    loss = jax.block_until_ready(weight_bce_with_logits_loss(pred, gt, **kwargs))
    ref = jax.block_until_ready(_reference(pred, gt))
    assert jnp.allclose(loss, ref, rtol=1e-5, atol=1e-6), (loss, ref)


if __name__ == "__main__":
    key = jax.random.PRNGKey(0)
    k1, k2, k3, k4, k5, k6, k7, k8 = jax.random.split(key, 8)

    # 1) Typical NCHW shape, lane-aligned: batch=2, channels=4, spatial=16x16.
    pred = jax.random.normal(k1, (2, 4, 16, 16), dtype=jnp.float32)
    gt = (jax.random.uniform(k2, (2, 4, 16, 16)) > 0.5).astype(jnp.float32)
    _check(pred, gt)

    # 2) Unaligned element count: exercises the plain-JAX tail path.
    pred = jax.random.normal(k3, (2, 3, 17, 19), dtype=jnp.float32)
    gt = (jax.random.uniform(k4, (2, 3, 17, 19)) > 0.5).astype(jnp.float32)
    _check(pred, gt)

    # 3) Multi-block reduction with a partial last block (and clamped
    #    overhang block on 2-TC chips): small max_block_rows to exercise it.
    pred = jax.random.normal(k5, (4, 5, 128), dtype=jnp.float32)
    gt = (jax.random.uniform(k6, (4, 5, 128)) > 0.5).astype(jnp.float32)
    _check(pred, gt, max_block_rows=8)

    # 4) Fewer than 128 elements: pure-JAX fallback.
    pred = jax.random.normal(k7, (3, 5, 7), dtype=jnp.float32)
    gt = (jax.random.uniform(k8, (3, 5, 7)) > 0.5).astype(jnp.float32)
    _check(pred, gt)

    print("KERNEL_OK")
</pallas_src>

<mosaic_0001>
module attributes {stable_mosaic.version = 11 : i64} {
  func.func @kernel(%arg0: i32, %arg1: i32, %arg2: memref<16x128xf32, #tpu.memory_space<vmem>>, %arg3: memref<16x128xf32, #tpu.memory_space<vmem>>, %arg4: memref<1x8x128xf32, #tpu.memory_space<vmem>>) attributes {dimension_semantics = [#tpu.dimension_semantics<parallel>, #tpu.dimension_semantics<arbitrary>], iteration_bounds = array<i64: 1, 1>, scalar_prefetch = 0 : i64, scratch_operands = 0 : i64, tpu.core_type = #tpu.core_type<tc>, window_params = [{transform_indices = @transform_0, window_bounds = array<i64: 16, 128>}, {transform_indices = @transform_1, window_bounds = array<i64: 16, 128>}, {transform_indices = @transform_2, window_bounds = array<i64: 1, 8, 128>}]} {
    %c1_i32 = arith.constant 1 : i32
    %0 = arith.muli %arg0, %c1_i32 : i32
    %1 = arith.addi %0, %arg1 : i32
    %c0_i32 = arith.constant 0 : i32
    %2 = arith.cmpi eq, %arg1, %c0_i32 : i32
    %3 = arith.extui %2 : i1 to i32
    %c0_i32_0 = arith.constant 0 : i32
    %4 = arith.cmpi ne, %3, %c0_i32_0 : i32
    scf.if %4 {
      %cst = arith.constant 0.000000e+00 : f32
      %8 = vector.broadcast %cst : f32 to vector<8x128xf32>
      %c0 = arith.constant 0 : index
      %c0_3 = arith.constant 0 : index
      %c0_4 = arith.constant 0 : index
      %9 = vector.load %arg4[%c0, %c0_3, %c0_4] : memref<1x8x128xf32, #tpu.memory_space<vmem>>, vector<1x8x128xf32>
      %10 = vector.shape_cast %9 : vector<1x8x128xf32> to vector<8x128xf32>
      %11 = vector.shape_cast %8 : vector<8x128xf32> to vector<1x8x128xf32>
      tpu.vector_store %arg4[%c0, %c0_3, %c0_4], %11 {strides = array<i32>} : memref<1x8x128xf32, #tpu.memory_space<vmem>>, vector<1x8x128xf32>,
    } else {
    }
    %c1_i32_1 = arith.constant 1 : i32
    %5 = arith.cmpi slt, %1, %c1_i32_1 : i32
    %6 = arith.extui %5 : i1 to i32
    %c0_i32_2 = arith.constant 0 : i32
    %7 = arith.cmpi ne, %6, %c0_i32_2 : i32
    scf.if %7 {
      %c0 = arith.constant 0 : index
      %c0_3 = arith.constant 0 : index
      %8 = vector.load %arg2[%c0, %c0_3] : memref<16x128xf32, #tpu.memory_space<vmem>>, vector<16x128xf32>
      %c0_4 = arith.constant 0 : index
      %c0_5 = arith.constant 0 : index
      %9 = vector.load %arg3[%c0_4, %c0_5] : memref<16x128xf32, #tpu.memory_space<vmem>>, vector<16x128xf32>
      %cst = arith.constant 0.000000e+00 : f32
      %10 = vector.broadcast %cst : f32 to vector<16x128xf32>
      %11 = arith.maximumf %8, %10 : vector<16x128xf32>
      %12 = math.absf %8 : vector<16x128xf32>
      %cst_6 = arith.constant 0.000000e+00 : f32
      %13 = vector.broadcast %cst_6 : f32 to vector<16x128xf32>
      %14 = arith.subf %13, %12 : vector<16x128xf32>
      %15 = math.exp %14 : vector<16x128xf32>
      %16 = math.log1p %15 : vector<16x128xf32>
      %17 = arith.addf %11, %16 : vector<16x128xf32>
      %18 = arith.subf %17, %8 : vector<16x128xf32>
      %cst_7 = arith.constant dense<0.000000e+00> : vector<128xf32>
      %19 = vector.multi_reduction <add>, %9, %cst_7 [0] : vector<16x128xf32> to vector<128xf32>
      %20 = vector.shape_cast %19 : vector<128xf32> to vector<1x128xf32>
      %21 = arith.mulf %9, %18 : vector<16x128xf32>
      %cst_8 = arith.constant dense<0.000000e+00> : vector<128xf32>
      %22 = vector.multi_reduction <add>, %21, %cst_8 [0] : vector<16x128xf32> to vector<128xf32>
      %23 = vector.shape_cast %22 : vector<128xf32> to vector<1x128xf32>
      %24 = arith.mulf %9, %17 : vector<16x128xf32>
      %25 = arith.subf %17, %24 : vector<16x128xf32>
      %cst_9 = arith.constant dense<0.000000e+00> : vector<128xf32>
      %26 = vector.multi_reduction <add>, %25, %cst_9 [0] : vector<16x128xf32> to vector<128xf32>
      %27 = vector.shape_cast %26 : vector<128xf32> to vector<1x128xf32>
      %cst_10 = arith.constant 0.000000e+00 : f32
      %28 = vector.broadcast %cst_10 : f32 to vector<5x128xf32>
      %c0_11 = arith.constant 0 : index
      %c0_12 = arith.constant 0 : index
      %c0_13 = arith.constant 0 : index
      %29 = vector.load %arg4[%c0_11, %c0_12, %c0_13] : memref<1x8x128xf32, #tpu.memory_space<vmem>>, vector<1x8x128xf32>
      %30 = vector.shape_cast %29 : vector<1x8x128xf32> to vector<8x128xf32>
      %31 = tpu.concatenate %20, %23, %27, %28 in 0 : vector<1x128xf32>, vector<1x128xf32>, vector<1x128xf32>, vector<5x128xf32> -> vector<8x128xf32>
      %32 = arith.addf %30, %31 : vector<8x128xf32>
      %c0_14 = arith.constant 0 : index
      %c0_15 = arith.constant 0 : index
      %c0_16 = arith.constant 0 : index
      %33 = vector.load %arg4[%c0_14, %c0_15, %c0_16] : memref<1x8x128xf32, #tpu.memory_space<vmem>>, vector<1x8x128xf32>
      %34 = vector.shape_cast %33 : vector<1x8x128xf32> to vector<8x128xf32>
      %35 = vector.shape_cast %32 : vector<8x128xf32> to vector<1x8x128xf32>
      tpu.vector_store %arg4[%c0_14, %c0_15, %c0_16], %35 {strides = array<i32>} : memref<1x8x128xf32, #tpu.memory_space<vmem>>, vector<1x8x128xf32>,
    } else {
    }
    return
  }
  func.func @transform_0(%arg0: i32, %arg1: i32) -> (i32, i32) {
    %c1_i32 = arith.constant 1 : i32
    %0 = arith.muli %arg0, %c1_i32 : i32
    %1 = arith.addi %0, %arg1 : i32
    %c0_i32 = arith.constant 0 : i32
    %2 = arith.minsi %1, %c0_i32 : i32
    %c0_i32_0 = arith.constant 0 : i32
    %c0_i32_1 = arith.constant 0 : i32
    return %2, %c0_i32_0 : i32, i32
  }
  func.func @transform_1(%arg0: i32, %arg1: i32) -> (i32, i32) {
    %c1_i32 = arith.constant 1 : i32
    %0 = arith.muli %arg0, %c1_i32 : i32
    %1 = arith.addi %0, %arg1 : i32
    %c0_i32 = arith.constant 0 : i32
    %2 = arith.minsi %1, %c0_i32 : i32
    %c0_i32_0 = arith.constant 0 : i32
    %c0_i32_1 = arith.constant 0 : i32
    return %2, %c0_i32_0 : i32, i32
  }
  func.func @transform_2(%arg0: i32, %arg1: i32) -> (i32, i32, i32) {
    %c0_i32 = arith.constant 0 : i32
    %c0_i32_0 = arith.constant 0 : i32
    %c0_i32_1 = arith.constant 0 : i32
    return %arg0, %c0_i32, %c0_i32_0 : i32, i32, i32
  }
}

</mosaic_0001>

<bundles_post_ra>
// kernel: tpu_custom_call.1
= control target key start
LH: loop header
LB: loop body
LE: loop exit
PB: predicated region body
PF: predicated region fallthrough
CT: control target
= control target key end

     0   :  { %7 = vsyncpa [#allocation3], 0  ;;  %s304_s0 = inlined_call_operand.hbm [shape: f32[16,128], index: 0, kind: input, shape index: {}]   ;;  %s305_s1 = inlined_call_operand.hbm [shape: f32[16,128], index: 1, kind: input, shape index: {}]   ;;  %s306_s2 = inlined_call_operand.hbm [shape: f32[1,8,128], index: 2, kind: output, shape index: {}]  }
   0x1   :  { %8 = vsyncpa [#allocation6], 0 }
   0x2   :  { %9 = vsyncpa [#allocation4], 0  ;;  %s248_s9 = smov [#allocation2]   ;;  %s176_s13 = scalar_lea.hbm %s304_s0, 256 }
   0x3   :  { %s21_s10 = sshll.u32 %s248_s9, 4  ;;  %p177_p0 = scmp.ne.s32.totalorder %s304_s0, %s176_s13  ;;  %s22_s10 = int_to_ptr.vmem [resolvable:$true] %s21_s10 }
   0x4   :  { %p180_p1 = scmp.lt.u32.totalorder %s176_s13, %s304_s0 }
   0x6   :  { %p182_p2 = pnand %p180_p1, %p177_p0 }
   0x8   :  { %185 = shalt.err (!%p182_p2)
}
   0x9   :  { %s186_s18 = scalar_lea.vmem %s22_s10, 256  ;;  %p191_p4 = scmp.lt.s32.totalorder %s22_s10, %s22_s10 }
   0xa   :  { %p187_p3 = scmp.ne.s32.totalorder %s22_s10, %s186_s18  ;;  %p192_p5 = scmp.lt.s32.totalorder %s186_s18, %s186_s18 }
   0xc   :  { %p193_p6 = por %p192_p5, %p191_p4 }
   0xe   :  { %p194_p7 = pnand %p193_p6, %p187_p3 }
  0x10   :  { %197 = shalt.err (!%p194_p7)
}
  0x11   :  { %s249_s19 = smov 128   ;;  %s250_s20 = smov 8  }
  0x12   :  { %27 = dma.hbm_to_vmem [thread:$0]  %s304_s0, 256, %s22_s10, [#allocation3], %s249_s19, %s249_s19, %s250_s20  }
  0x13   :  { %s251_s23 = smov [#allocation5]   ;;  %s198_s27 = scalar_lea.hbm %s305_s1, 256 }
  0x14   :  { %s39_s24 = sshll.u32 %s251_s23, 4  ;;  %p199_p8 = scmp.ne.s32.totalorder %s305_s1, %s198_s27  ;;  %s40_s24 = int_to_ptr.vmem [resolvable:$true] %s39_s24 }
  0x15   :  { %p202_p9 = scmp.lt.u32.totalorder %s198_s27, %s305_s1 }
  0x17   :  { %p204_p10 = pnand %p202_p9, %p199_p8 }
  0x19   :  { %207 = shalt.err (!%p204_p10)
}
  0x1a   :  { %s208_s4 = scalar_lea.vmem %s40_s24, 256  ;;  %p213_p12 = scmp.lt.s32.totalorder %s40_s24, %s40_s24 }
  0x1b   :  { %p209_p11 = scmp.ne.s32.totalorder %s40_s24, %s208_s4  ;;  %p214_p13 = scmp.lt.s32.totalorder %s208_s4, %s208_s4 }
  0x1d   :  { %p215_p0 = por %p214_p13, %p213_p12 }
  0x1f   :  { %p216_p1 = pnand %p215_p0, %p209_p11 }
  0x21   :  { %219 = shalt.err (!%p216_p1)
}
  0x22   :  { %45 = dma.hbm_to_vmem [thread:$0]  %s305_s1, 256, %s40_s24, [#allocation6], %s249_s19, %s249_s19, %s250_s20  }
  0x23   :  { %242 = dma.done.wait [#allocation3], 256  }
  0x24   :  { %243 = vsyncadd [#allocation3], 4294967040 }
  0x25   :  { %244 = dma.done.wait [#allocation6], 256  }
  0x26   :  { %245 = vsyncadd [#allocation6], 4294967040  ;;  %v70_v0 = vld [vmem:[#allocation2] sm:$0xff]  ;;  %v71_v1 = vld [vmem:[#allocation2 + $0x8] sm:$0xff]  ;;  %vm134_vm2 = vcmask 1040384   ;;  %vm136_vm3 = vcmask 1041408  }
  0x27   :  { %v76_v2 = vand.u32 2147483647, %v70_v0  ;;  %v77_v3 = vand.u32 2147483647, %v71_v1  ;;  %v72_v15 = vld [vmem:[#allocation5] sm:$0xff]  ;;  %v73_v16 = vld [vmem:[#allocation5 + $0x8] sm:$0xff] }
  0x28   :  { %v106_v20 = vadd.f32 %v73_v16, %v72_v15  ;;  %v74_v23 = vmax.f32 %v70_v0, 0.0  ;;  %v75_v26 = vmax.f32 %v71_v1, 0.0  ;;  %vm138_vm4 = vcmask 1042432   ;;  %s252_s1 = smov [#allocation7]  }
  0x29   :  { %v78_v4 = vsub.f32 0.0, %v76_v2  ;;  %v79_v5 = vsub.f32 0.0, %v77_v3  ;;  %s148_s6 = sshll.u32 %s252_s1, 4  ;;  %s149_s6 = int_to_ptr.vmem [resolvable:$true] %s148_s6 }
  0x2a   :  { %v107_v28 = vrot.slane %v106_v20, 4  ;;  %s220_s7 = scalar_lea.vmem %s149_s6, 128  ;;  %p225_p3 = scmp.lt.s32.totalorder %s149_s6, %s149_s6 }
  0x2b   :  { %v80_v6 = vmul.f32 1.442695, %v78_v4  ;;  %v82_v7 = vmul.f32 1.442695, %v79_v5  ;;  %p221_p2 = scmp.ne.s32.totalorder %s149_s6, %s220_s7  ;;  %p226_p4 = scmp.lt.s32.totalorder %s220_s7, %s220_s7 }
  0x2c   :  { %v108_v34 = vadd.f32 %v107_v28, %v106_v20 }
  0x2d   :  { %168 = vpow2.f32 %v80_v6  ;;  %p227_p5 = por %p226_p4, %p225_p3 }
  0x2e   :  { %170 = vpow2.f32 %v82_v7  ;;  %v109_v41 = vrot.slane %v108_v34, 2 }
  0x2f   :  { %p228_p6 = pnand %p227_p5, %p221_p2 }
  0x30   :  { %v110_v46 = vadd.f32 %v109_v41, %v108_v34 }
  0x32   :  { %v111_v51 = vrot.slane %v110_v46, 1 }
  0x34   :  { %v112_v56 = vadd.f32 %v111_v51, %v110_v46 }
  0x37   :  { %v169_v8 = vpop.eup %168 }
  0x38   :  { %v171_v9 = vpop.eup %170  ;;  %v84_v10 = vadd.f32 1.0, %v169_v8  ;;  %v87_v12 = vmul.f32 -0.5, %v169_v8  ;;  %v90_v17 = vand.u32 2147483647, %v169_v8 }
  0x39   :  { %v93_v11 = vadd.f32 1.0, %v171_v9  ;;  %v96_v13 = vmul.f32 -0.5, %v171_v9  ;;  %v99_v19 = vand.u32 2147483647, %v171_v9 }
  0x3a   :  { %172 = vlog2.f32 %v84_v10  ;;  %v88_v14 = vadd.f32 1.0, %v87_v12  ;;  %vm91_vm0 = vcmp.lt.f32.partialorder %v90_v17, 0.0004427343 }
  0x3b   :  { %174 = vlog2.f32 %v93_v11  ;;  %v97_v18 = vadd.f32 1.0, %v96_v13  ;;  %vm100_vm1 = vcmp.lt.f32.partialorder %v99_v19, 0.0004427343 }
  0x3c   :  { %v89_v21 = vmul.f32 %v169_v8, %v88_v14 }
  0x3d   :  { %v98_v24 = vmul.f32 %v171_v9, %v97_v18 }
  0x44   :  { %v173_v22 = vpop.eup %172 }
  0x45   :  { %v175_v25 = vpop.eup %174  ;;  %v86_v27 = vmul.f32 0.6931472, %v173_v22 }
  0x46   :  { %v95_v29 = vmul.f32 0.6931472, %v175_v25 }
  0x47   :  { %v92_v30 = vsel %vm91_vm0, %v89_v21, %v86_v27 }
  0x48   :  { %v101_v31 = vsel %vm100_vm1, %v98_v24, %v95_v29  ;;  %v102_v32 = vadd.f32 %v92_v30, %v74_v23 }
  0x49   :  { %v103_v33 = vadd.f32 %v101_v31, %v75_v26 }
  0x4a   :  { %v104_v35 = vsub.f32 %v102_v32, %v70_v0  ;;  %v122_v36 = vmul.f32 %v102_v32, %v72_v15 }
  0x4b   :  { %v105_v37 = vsub.f32 %v103_v33, %v71_v1  ;;  %v123_v38 = vmul.f32 %v103_v33, %v73_v16 }
  0x4c   :  { %v113_v39 = vmul.f32 %v104_v35, %v72_v15  ;;  %v124_v40 = vsub.f32 %v102_v32, %v122_v36 }
  0x4d   :  { %v114_v42 = vmul.f32 %v105_v37, %v73_v16  ;;  %v125_v43 = vsub.f32 %v103_v33, %v123_v38 }
  0x4f   :  { %v115_v44 = vadd.f32 %v114_v42, %v113_v39  ;;  %v126_v45 = vadd.f32 %v125_v43, %v124_v40 }
  0x51   :  { %v116_v47 = vrot.slane %v115_v44, 4  ;;  %v127_v48 = vrot.slane %v126_v45, 4 }
  0x53   :  { %v117_v49 = vadd.f32 %v116_v47, %v115_v44  ;;  %v128_v50 = vadd.f32 %v127_v48, %v126_v45 }
  0x55   :  { %v118_v52 = vrot.slane %v117_v49, 2  ;;  %v129_v53 = vrot.slane %v128_v50, 2 }
  0x57   :  { %v119_v54 = vadd.f32 %v118_v52, %v117_v49  ;;  %v130_v55 = vadd.f32 %v129_v53, %v128_v50 }
  0x59   :  { %v120_v57 = vrot.slane %v119_v54, 1  ;;  %v131_v58 = vrot.slane %v130_v55, 1 }
  0x5b   :  { %v121_v59 = vadd.f32 %v120_v57, %v119_v54  ;;  %v132_v60 = vadd.f32 %v131_v58, %v130_v55 }
  0x5d   :  { %v135_v61 = vsel %vm134_vm2, %v112_v56, %v121_v59 }
  0x5e   :  { %v137_v62 = vsel %vm136_vm3, %v135_v61, %v132_v60 }
  0x5f   :  { %v139_v63 = vsel %vm138_vm4, %v137_v62, 0.0 }
  0x60   :  { %141 = vst [vmem:[#allocation7] sm:$0xff] %v139_v63 }
  0x61   :  { %231 = shalt.err (!%p228_p6)
}
  0x62   :  { %s232_s10 = scalar_lea.hbm %s306_s2, 128 }
  0x63   :  { %p233_p7 = scmp.ne.s32.totalorder %s306_s2, %s232_s10  ;;  %p236_p8 = scmp.lt.u32.totalorder %s232_s10, %s306_s2 }
  0x65   :  { %p238_p9 = pnand %p236_p8, %p233_p7 }
  0x67   :  { %241 = shalt.err (!%p238_p9)
}
  0x68   :  { %151 = dma.vmem_to_hbm [thread:$0]  %s149_s6, 128, %s306_s2, [#allocation4]  }
  0x69   :  { %246 = dma.done.wait [#allocation4], 128  }
  0x6a   :  { %247 = vsyncadd [#allocation4], 4294967168 }
  0x6b   :  { %155 = vsyncpa [#allocation3], 1 }
  0x6c   :  { %156 = vsyncpa [#allocation6], 1 }
  0x6d   :  { %157 = vsyncpa [#allocation4], 1 }

</bundles_post_ra>
